<compile_context>
chip_gen: v7x
topology: tpu7x:2x2x1
jax: 0.10.0
libtpu: 0.0.40
codegen_flags: <defaults>
</compile_context>

<pallas_src>
import jax
import jax.numpy as jnp
from jax.experimental import pallas as pl
from jax.experimental.pallas import tpu as pltpu


def _round_up(n, m):
    return ((n + m - 1) // m) * m


def simplenet_kernel(x_ref,
                     w1_ref, b1_ref,
                     w2_ref, b2_ref,
                     w3_ref, b3_ref,
                     w4_ref, b4_ref,
                     o_ref):
    # Activations are (features, batch_tile): batch on lanes, features on
    # sublanes.  Each layer: y = tanh(W @ y + b), W = (out, in), b = (out, 1)
    # broadcasting across the lane (batch) axis.
    y = jnp.tanh(jnp.dot(w1_ref[...], x_ref[...],
                         preferred_element_type=jnp.float32) + b1_ref[...])
    y = jnp.tanh(jnp.dot(w2_ref[...], y,
                         preferred_element_type=jnp.float32) + b2_ref[...])
    y = jnp.tanh(jnp.dot(w3_ref[...], y,
                         preferred_element_type=jnp.float32) + b3_ref[...])
    y = jnp.tanh(jnp.dot(w4_ref[...], y,
                         preferred_element_type=jnp.float32) + b4_ref[...])
    o_ref[...] = y.astype(o_ref.dtype)


def simplenet_forward(x, params, *, b_tile=512):
    """x: (B, 2) float32 (PyTorch nn.Linear convention).  Returns (B, 1)."""
    B = x.shape[0]
    # Lane-dense batch tile: multiple of 128, never larger than the padded batch.
    b_tile = min(b_tile, _round_up(B, 128))
    Bp = _round_up(B, b_tile)

    # Feature-major layout: (2, Bp) with zero-padded batch columns (discarded
    # after the call).  Transpose/pad in the wrapper, not in-kernel.
    xt = jnp.zeros((2, Bp), jnp.float32).at[:, :B].set(x.T)

    weights_and_biases = (
        params["w1"], params["b1"],
        params["w2"], params["b2"],
        params["w3"], params["b3"],
        params["w4"], params["b4"],
    )

    # x is tiled along the batch (lane) axis; weights/biases are tiny, use a
    # constant index_map and stay resident across all grid steps.
    in_specs = [pl.BlockSpec((2, b_tile), lambda i: (0, i))]
    for a in weights_and_biases:
        # Bind ndim per-array (fixes the late-binding closure bug).
        in_specs.append(pl.BlockSpec(a.shape, lambda i, _nd=a.ndim: (0,) * _nd))
    out_spec = pl.BlockSpec((1, b_tile), lambda i: (0, i))

    # TODO(synk): for v6e/v7x, casting x/weights to bf16 (keeping f32
    # accumulation) would halve HBM traffic; kept f32 here for exact parity
    # with the f32 reference.
    out_t = pl.pallas_call(
        simplenet_kernel,
        out_shape=jax.ShapeDtypeStruct((1, Bp), jnp.float32),
        grid=(Bp // b_tile,),
        in_specs=in_specs,
        out_specs=out_spec,
        compiler_params=pltpu.CompilerParams(
            dimension_semantics=("parallel",)),
    )(xt, *weights_and_biases)

    return out_t[:, :B].T  # back to (B, 1)


def init_params(key):
    """Deterministic synthetic init matching nn.Linear (W: (out, in), b: (out, 1))."""
    sizes = [(2, 12), (12, 8), (8, 4), (4, 1)]
    params = {}
    for idx, (fan_in, fan_out) in enumerate(sizes, start=1):
        key, kw, kb = jax.random.split(key, 3)
        bound = 1.0 / jnp.sqrt(fan_in)  # same bound PyTorch uses for Linear init
        params[f"w{idx}"] = jax.random.uniform(
            kw, (fan_out, fan_in), jnp.float32, -bound, bound)
        params[f"b{idx}"] = jax.random.uniform(
            kb, (fan_out, 1), jnp.float32, -bound, bound)
    return params


def reference_forward(x, params):
    y = jnp.tanh(x @ params["w1"].T + params["b1"].T)
    y = jnp.tanh(y @ params["w2"].T + params["b2"].T)
    y = jnp.tanh(y @ params["w3"].T + params["b3"].T)
    y = jnp.tanh(y @ params["w4"].T + params["b4"].T)
    return y


if __name__ == "__main__":
    key = jax.random.PRNGKey(0)
    key, kx = jax.random.split(key)
    batch = 8
    x = jax.random.normal(kx, (batch, 2), jnp.float32)  # SimpleNet expects 2 input features

    params = init_params(key)

    out = simplenet_forward(x, params)
    out = jax.block_until_ready(out)

    ref = reference_forward(x, params)
    assert out.shape == (batch, 1)
    assert jnp.allclose(out, ref, rtol=1e-4, atol=1e-5)

    print("KERNEL_OK")
</pallas_src>

<mosaic_0001>
module attributes {stable_mosaic.version = 11 : i64} {
  func.func @simplenet_kernel(%arg0: i32, %arg1: memref<2x128xf32, #tpu.memory_space<vmem>>, %arg2: memref<12x2xf32, #tpu.memory_space<vmem>>, %arg3: memref<12x1xf32, #tpu.memory_space<vmem>>, %arg4: memref<8x12xf32, #tpu.memory_space<vmem>>, %arg5: memref<8x1xf32, #tpu.memory_space<vmem>>, %arg6: memref<4x8xf32, #tpu.memory_space<vmem>>, %arg7: memref<4x1xf32, #tpu.memory_space<vmem>>, %arg8: memref<1x4xf32, #tpu.memory_space<vmem>>, %arg9: memref<1x1xf32, #tpu.memory_space<vmem>>, %arg10: memref<1x128xf32, #tpu.memory_space<vmem>>) attributes {dimension_semantics = [#tpu.dimension_semantics<parallel>], iteration_bounds = array<i64: 1>, scalar_prefetch = 0 : i64, scratch_operands = 0 : i64, tpu.core_type = #tpu.core_type<tc>, window_params = [{transform_indices = @transform_0, window_bounds = array<i64: 2, 128>}, {pipeline_mode = #tpu.pipeline_mode<synchronous>, transform_indices = @transform_1, window_bounds = array<i64: 12, 2>}, {pipeline_mode = #tpu.pipeline_mode<synchronous>, transform_indices = @transform_2, window_bounds = array<i64: 12, 1>}, {pipeline_mode = #tpu.pipeline_mode<synchronous>, transform_indices = @transform_3, window_bounds = array<i64: 8, 12>}, {pipeline_mode = #tpu.pipeline_mode<synchronous>, transform_indices = @transform_4, window_bounds = array<i64: 8, 1>}, {pipeline_mode = #tpu.pipeline_mode<synchronous>, transform_indices = @transform_5, window_bounds = array<i64: 4, 8>}, {pipeline_mode = #tpu.pipeline_mode<synchronous>, transform_indices = @transform_6, window_bounds = array<i64: 4, 1>}, {pipeline_mode = #tpu.pipeline_mode<synchronous>, transform_indices = @transform_7, window_bounds = array<i64: 1, 4>}, {pipeline_mode = #tpu.pipeline_mode<synchronous>, transform_indices = @transform_8, window_bounds = array<i64: 1, 1>}, {transform_indices = @transform_9, window_bounds = array<i64: 1, 128>}]} {
    %c0 = arith.constant 0 : index
    %c0_0 = arith.constant 0 : index
    %0 = vector.load %arg2[%c0, %c0_0] : memref<12x2xf32, #tpu.memory_space<vmem>>, vector<12x2xf32>
    %c0_1 = arith.constant 0 : index
    %c0_2 = arith.constant 0 : index
    %1 = vector.load %arg1[%c0_1, %c0_2] : memref<2x128xf32, #tpu.memory_space<vmem>>, vector<2x128xf32>
    %cst = arith.constant dense<0.000000e+00> : vector<12x128xf32>
    %2 = tpu.matmul %0, %1, %cst {dimension_numbers = #tpu.dot_dimension_numbers<[1], [0], [0], [1], [0, 0, 1, 1], [], []>} : vector<12x2xf32>, vector<2x128xf32>, vector<12x128xf32> -> vector<12x128xf32>
    %c0_3 = arith.constant 0 : index
    %c0_4 = arith.constant 0 : index
    %3 = vector.load %arg3[%c0_3, %c0_4] : memref<12x1xf32, #tpu.memory_space<vmem>>, vector<12x1xf32>
    %4 = vector.broadcast %3 : vector<12x1xf32> to vector<12x128xf32>
    %5 = arith.addf %2, %4 : vector<12x128xf32>
    %6 = math.tanh %5 : vector<12x128xf32>
    %c0_5 = arith.constant 0 : index
    %c0_6 = arith.constant 0 : index
    %7 = vector.load %arg4[%c0_5, %c0_6] : memref<8x12xf32, #tpu.memory_space<vmem>>, vector<8x12xf32>
    %cst_7 = arith.constant dense<0.000000e+00> : vector<8x128xf32>
    %8 = tpu.matmul %7, %6, %cst_7 {dimension_numbers = #tpu.dot_dimension_numbers<[1], [0], [0], [1], [0, 0, 1, 1], [], []>} : vector<8x12xf32>, vector<12x128xf32>, vector<8x128xf32> -> vector<8x128xf32>
    %c0_8 = arith.constant 0 : index
    %c0_9 = arith.constant 0 : index
    %9 = vector.load %arg5[%c0_8, %c0_9] : memref<8x1xf32, #tpu.memory_space<vmem>>, vector<8x1xf32>
    %10 = vector.broadcast %9 : vector<8x1xf32> to vector<8x128xf32>
    %11 = arith.addf %8, %10 : vector<8x128xf32>
    %12 = math.tanh %11 : vector<8x128xf32>
    %c0_10 = arith.constant 0 : index
    %c0_11 = arith.constant 0 : index
    %13 = vector.load %arg6[%c0_10, %c0_11] : memref<4x8xf32, #tpu.memory_space<vmem>>, vector<4x8xf32>
    %cst_12 = arith.constant dense<0.000000e+00> : vector<4x128xf32>
    %14 = tpu.matmul %13, %12, %cst_12 {dimension_numbers = #tpu.dot_dimension_numbers<[1], [0], [0], [1], [0, 0, 1, 1], [], []>} : vector<4x8xf32>, vector<8x128xf32>, vector<4x128xf32> -> vector<4x128xf32>
    %c0_13 = arith.constant 0 : index
    %c0_14 = arith.constant 0 : index
    %15 = vector.load %arg7[%c0_13, %c0_14] : memref<4x1xf32, #tpu.memory_space<vmem>>, vector<4x1xf32>
    %16 = vector.broadcast %15 : vector<4x1xf32> to vector<4x128xf32>
    %17 = arith.addf %14, %16 : vector<4x128xf32>
    %18 = math.tanh %17 : vector<4x128xf32>
    %c0_15 = arith.constant 0 : index
    %c0_16 = arith.constant 0 : index
    %19 = vector.load %arg8[%c0_15, %c0_16] : memref<1x4xf32, #tpu.memory_space<vmem>>, vector<1x4xf32>
    %cst_17 = arith.constant dense<0.000000e+00> : vector<1x128xf32>
    %20 = tpu.matmul %19, %18, %cst_17 {dimension_numbers = #tpu.dot_dimension_numbers<[1], [0], [0], [1], [0, 0, 1, 1], [], []>} : vector<1x4xf32>, vector<4x128xf32>, vector<1x128xf32> -> vector<1x128xf32>
    %c0_18 = arith.constant 0 : index
    %c0_19 = arith.constant 0 : index
    %21 = vector.load %arg9[%c0_18, %c0_19] : memref<1x1xf32, #tpu.memory_space<vmem>>, vector<1x1xf32>
    %22 = vector.broadcast %21 : vector<1x1xf32> to vector<1x128xf32>
    %23 = arith.addf %20, %22 : vector<1x128xf32>
    %24 = math.tanh %23 : vector<1x128xf32>
    %c0_20 = arith.constant 0 : index
    %c0_21 = arith.constant 0 : index
    %25 = vector.load %arg10[%c0_20, %c0_21] : memref<1x128xf32, #tpu.memory_space<vmem>>, vector<1x128xf32>
    tpu.vector_store %arg10[%c0_20, %c0_21], %24 {strides = array<i32>} : memref<1x128xf32, #tpu.memory_space<vmem>>, vector<1x128xf32>,
    return
  }
  func.func @transform_0(%arg0: i32) -> (i32, i32) {
    %c0_i32 = arith.constant 0 : i32
    %c0_i32_0 = arith.constant 0 : i32
    return %c0_i32, %arg0 : i32, i32
  }
  func.func @transform_1(%arg0: i32) -> (i32, i32) {
    %c0_i32 = arith.constant 0 : i32
    %c0_i32_0 = arith.constant 0 : i32
    %c0_i32_1 = arith.constant 0 : i32
    return %c0_i32, %c0_i32_0 : i32, i32
  }
  func.func @transform_2(%arg0: i32) -> (i32, i32) {
    %c0_i32 = arith.constant 0 : i32
    %c0_i32_0 = arith.constant 0 : i32
    %c0_i32_1 = arith.constant 0 : i32
    return %c0_i32, %c0_i32_0 : i32, i32
  }
  func.func @transform_3(%arg0: i32) -> (i32, i32) {
    %c0_i32 = arith.constant 0 : i32
    %c0_i32_0 = arith.constant 0 : i32
    %c0_i32_1 = arith.constant 0 : i32
    return %c0_i32, %c0_i32_0 : i32, i32
  }
  func.func @transform_4(%arg0: i32) -> (i32, i32) {
    %c0_i32 = arith.constant 0 : i32
    %c0_i32_0 = arith.constant 0 : i32
    %c0_i32_1 = arith.constant 0 : i32
    return %c0_i32, %c0_i32_0 : i32, i32
  }
  func.func @transform_5(%arg0: i32) -> (i32, i32) {
    %c0_i32 = arith.constant 0 : i32
    %c0_i32_0 = arith.constant 0 : i32
    %c0_i32_1 = arith.constant 0 : i32
    return %c0_i32, %c0_i32_0 : i32, i32
  }
  func.func @transform_6(%arg0: i32) -> (i32, i32) {
    %c0_i32 = arith.constant 0 : i32
    %c0_i32_0 = arith.constant 0 : i32
    %c0_i32_1 = arith.constant 0 : i32
    return %c0_i32, %c0_i32_0 : i32, i32
  }
  func.func @transform_7(%arg0: i32) -> (i32, i32) {
    %c0_i32 = arith.constant 0 : i32
    %c0_i32_0 = arith.constant 0 : i32
    %c0_i32_1 = arith.constant 0 : i32
    return %c0_i32, %c0_i32_0 : i32, i32
  }
  func.func @transform_8(%arg0: i32) -> (i32, i32) {
    %c0_i32 = arith.constant 0 : i32
    %c0_i32_0 = arith.constant 0 : i32
    %c0_i32_1 = arith.constant 0 : i32
    return %c0_i32, %c0_i32_0 : i32, i32
  }
  func.func @transform_9(%arg0: i32) -> (i32, i32) {
    %c0_i32 = arith.constant 0 : i32
    %c0_i32_0 = arith.constant 0 : i32
    return %c0_i32, %arg0 : i32, i32
  }
}

</mosaic_0001>

<bundles_post_ra>
// kernel: tpu_custom_call.1
= control target key start
LH: loop header
LB: loop body
LE: loop exit
PB: predicated region body
PF: predicated region fallthrough
CT: control target
= control target key end

     0   :  { %s602_s0 = inlined_call_operand.vmem [shape: f32[2,128], index: 0, kind: input, shape index: {}]   ;;  %s603_s1 = inlined_call_operand.vmem [shape: f32[12,2], index: 1, kind: input, shape index: {}]   ;;  %s604_s2 = inlined_call_operand.vmem [shape: f32[12,1], index: 2, kind: input, shape index: {}]   ;;  %s605_s3 = inlined_call_operand.vmem [shape: f32[8,12], index: 3, kind: input, shape index: {}]   ;;  %s606_s4 = inlined_call_operand.vmem [shape: f32[8,1], index: 4, kind: input, shape index: {}]   ;;  %s607_s5 = inlined_call_operand.vmem [shape: f32[4,8], index: 5, kind: input, shape index: {}]   ;;  %s608_s6 = inlined_call_operand.vmem [shape: f32[4,1], index: 6, kind: input, shape index: {}]   ;;  %s609_s7 = inlined_call_operand.vmem [shape: f32[1,4], index: 7, kind: input, shape index: {}]   ;;  %s610_s8 = inlined_call_operand.<no memory space> [shape: f32[1,1], index: 8, kind: input, shape index: {}]   ;;  %s611_s9 = inlined_call_operand.hbm [shape: f32[1,128], index: 9, kind: output, shape index: {}]  }
   0x1   :  { %v14_v0 = vstv %s610_s8 }
   0x2   :  { %15 = vst [vmem:[#allocation2] sm:$0x1] %v14_v0 }
   0x3   :  { %v37_v1 = vld [vmem:[%s602_s0] sm:$0x3]  ;;  %vm57_vm0 = vcmask 1041408   ;;  %vm50_vm1 = vcmask 15360   ;;  %v36_v3 = vld [vmem:[%s603_s1 + $0x8] sm:$0xf] }
   0x4   :  { %v35_v2 = vld [vmem:[%s603_s1] sm:$0xff]  ;;  %428 = vmatprep.subr.msk.mxu0 %vm57_vm0, %v37_v1  ;;  %v496_v5 = vmov 0  }
   0x5   :  { %430 = vmatprep.mubr.msk.f32.mxu0 %vm50_vm1, %v35_v2  ;;  %v38_v4 = vld [vmem:[%s604_s2] sm:$0xff]  ;;  %429 = vmatpush3.msk.msra.mxu0 %vm57_vm0, %v37_v1 }
   0x6   :  { %460 = vset.pattern.permute.xlu0 %v496_v5 }
   0x7   :  { %16 = vsyncpa [#allocation4], 0  ;;  %431 = vmatmul.mubr.msk.f32.vlgmr.msra.gmra.mrb[0].mxu0 %vm50_vm1, %v36_v3  ;;  %42 = vperm.xlu0 %460, %v38_v4   ;;  %v39_v6 = vld [vmem:[%s604_s2 + $0x8] sm:$0xf]  ;;  %v497_v8 = vmov 0.0|0.0   ;;  %vm498_vm2 = vmmov 0   ;;  %v313_v34 = vlaneseq }
   0x8   :  { %461 = vset.pattern.permute.xlu1 %v496_v5  ;;  %450 = vmatprep.subr.bf16.mxu1 %v497_v8  ;;  %v499_v9 = vmov 0.0   ;;  %v139_v10 = vld [vmem:[%s606_s4] sm:$0xff]  ;;  %vm149_vm3 = vcmask 1043456   ;;  %vm500_vm4 = vmmov 1   ;;  %vm145_vm6 = vcmask 97280  }
   0x9   :  { %v307_v7 = vld [vmem:[#allocation2] sm:$0x1]  ;;  %437 = vmatprep.mubr.msk.f32.mxu1 %vm498_vm2, %v499_v9  ;;  %440 = vmatprep.subr.mxu0 %v499_v9  ;;  %vm452_vm5 = vmpackc.low %vm149_vm3, %vm500_vm4  ;;  %vm231_vm7 = vcmask 64512   ;;  %vm317_vm8 = vcmask 31744   ;;  %v314_v35 = vshrl.u32 %v313_v34, 7 }
   0xa   :  { %442 = vmatprep.mubr.msk.f32.mxu0 %vm498_vm2, %v499_v9  ;;  %142 = vperm.xlu1 %461, %v139_v10   ;;  %v225_v11 = vld [vmem:[%s608_s6] sm:$0xf] }
   0xb   :  { %47 = vperm.xlu0 %460, %v39_v6   ;;  %v138_v21 = vld [vmem:[%s605_s3] sm:$0xff]  ;;  %v315_v36 = vsub.s32 0, %v314_v35 }
   0xc   :  { %v224_v26 = vld [vmem:[%s607_s5] sm:$0xf]  ;;  %s501_s5 = smov [#allocation3]  }
   0xd   :  { %v306_v32 = vld [vmem:[%s609_s7] sm:$0x1]  ;;  %s402_s24 = sshll.u32 %s501_s5, 4  ;;  %s403_s24 = int_to_ptr.vmem [resolvable:$true] %s402_s24 }
   0xe   :  { %228 = vperm.xlu1 %461, %v225_v11   ;;  %s472_s7 = scalar_lea.vmem %s403_s24, 16  ;;  %s476_s25 = scalar_lea.vmem %s403_s24, 32 }
   0xf   :  { %310 = vperm.xlu0 %460, %v307_v7   ;;  %p473_p0 = scmp.ne.s32.totalorder %s403_s24, %s472_s7  ;;  %p477_p1 = scmp.lt.s32.totalorder %s403_s24, %s403_s24 }
  0x10   :  { %p478_p2 = scmp.lt.s32.totalorder %s476_s25, %s472_s7 }
  0x12   :  { %p479_p3 = por %p478_p2, %p477_p1 }
  0x14   :  { %p480_p4 = pnand %p479_p3, %p473_p0 }
  0x86   :  { %v43_v12 = vpop.permute.xlu0 %42 }
  0x89   :  { %v143_v22 = vpop.permute.xlu1 %142 }
  0x8a   :  { %v48_v13 = vpop.permute.xlu0 %47 }
  0x8d   :  { %v229_v28 = vpop.permute.xlu1 %228 }
  0x8e   :  { %v311_v37 = vpop.permute.xlu0 %310 }
  0x8f   :  { %v316_v38 = vrot.slane %v311_v37, %v315_v36 }
  0xda   :  { %v432_v14 = vpop.f32.mrb[0].mxu0 }
  0xdb   :  { %v133_v15 = vadd.f32 %v432_v14, %v48_v13  ;;  %v127_v16 = vpop.f32.mrb[1].mxu0 }
  0xdc   :  { %v128_v17 = vadd.f32 %v127_v16, %v43_v12 }
  0xdd   :  { %462 = vtanh.f32 %v133_v15 }
  0xde   :  { %464 = vtanh.f32 %v128_v17 }
  0xe7   :  { %v463_v18 = vpop.eup %462 }
  0xe8   :  { %v465_v19 = vpop.eup %464 }
  0xe9   :  { %v451_v20 = vpack.c.bf16 %v463_v18, %v465_v19 }
  0xeb   :  { %453 = vmatpush3.bf16.msk.msra.mxu1 %vm452_vm5, %v451_v20 }
  0xec   :  { %445 = vmatprep.subr.mxu1 %v499_v9 }
  0xee   :  { %438 = vmatmul.mubr.msk.f32.vlgmr.msra.gmra.mrb[0].mxu1 %vm145_vm6, %v138_v21 }
  0xef   :  { %447 = vmatprep.mubr.msk.f32.mxu1 %vm498_vm2, %v499_v9 }
 0x1c1   :  { %v219_v23 = vpop.f32.mrb[0].mxu1 }
 0x1c2   :  { %v220_v24 = vadd.f32 %v219_v23, %v143_v22  ;;  %v439_v25 = vpop.f32.mrb[1].mxu1 }
 0x1c4   :  { %466 = vtanh.f32 %v220_v24 }
 0x1ce   :  { %v467_v27 = vpop.eup %466 }
 0x1cf   :  { %441 = vmatpush3.msra.mxu0 %v467_v27 }
 0x1d0   :  { %443 = vmatmul.mubr.msk.f32.vlgmr.msra.gmra.mrb[2].mxu0 %vm231_vm7, %v224_v26 }
 0x2a3   :  { %v301_v29 = vpop.f32.mrb[2].mxu0 }
 0x2a4   :  { %v302_v30 = vadd.f32 %v301_v29, %v229_v28  ;;  %v444_v31 = vpop.f32.mrb[3].mxu0 }
 0x2a6   :  { %468 = vtanh.f32 %v302_v30 }
 0x2b0   :  { %v469_v33 = vpop.eup %468 }
 0x2b1   :  { %446 = vmatpush3.msk.msra.mxu1 %vm149_vm3, %v469_v33 }
 0x2b2   :  { %448 = vmatmul.mubr.msk.f32.vlgmr.msra.gmra.mrb[2].mxu1 %vm317_vm8, %v306_v32 }
 0x385   :  { %v390_v39 = vpop.f32.mrb[2].mxu1 }
 0x386   :  { %v391_v40 = vadd.f32 %v390_v39, %v316_v38  ;;  %v449_v41 = vpop.f32.mrb[3].mxu1 }
 0x388   :  { %470 = vtanh.f32 %v391_v40 }
 0x392   :  { %v471_v42 = vpop.eup %470 }
 0x393   :  { %395 = vst [vmem:[#allocation3] sm:$0x1] %v471_v42 }
 0x394   :  { %483 = shalt.err (!%p480_p4)
}
 0x395   :  { %s484_s28 = scalar_lea.hbm %s611_s9, 16 }
 0x396   :  { %p485_p5 = scmp.ne.s32.totalorder %s611_s9, %s484_s28  ;;  %p488_p6 = scmp.lt.u32.totalorder %s484_s28, %s611_s9 }
 0x398   :  { %p490_p7 = pnand %p488_p6, %p485_p5 }
 0x39a   :  { %493 = shalt.err (!%p490_p7)
}
 0x39b   :  { %405 = dma.vmem_to_hbm [thread:$0]  %s403_s24, 16, %s611_s9, [#allocation4]  }
 0x39c   :  { %494 = dma.done.wait [#allocation4], 16  }
 0x39d   :  { %495 = vsyncadd [#allocation4], 4294967280 }
 0x39e   :  { %409 = vsyncpa [#allocation4], 1 }

</bundles_post_ra>
